<compile_context>
chip_gen: v6e
topology: v6e:2x2x1
jax: 0.10.0
libtpu: 0.0.40
codegen_flags: <defaults>
</compile_context>

<pallas_src>
import functools

import numpy as np
import jax
import jax.numpy as jnp
from jax.experimental import pallas as pl
from jax.experimental.pallas import tpu as pltpu


def _round_up(x, m):
    return (x + m - 1) // m * m


def _vmem_limit_bytes():
    """Generation-aware VMEM limit: ~75% of physical, capped at 96 MiB."""
    try:
        cap = int(pltpu.get_tpu_info().vmem_capacity_bytes)
    except Exception:
        cap = 64 * 1024 * 1024          # conservative default (v7x per-TC VMEM)
    return min(cap * 3 // 4, 96 * 1024 * 1024)


def _pick_batch_tile(B, S, E, w_pad, n_cat, Lp, cat_pad, in_itemsize, vmem_limit):
    """Largest batch tile whose *live set* fits the VMEM budget, capped so the
    grid has at least 2 (ideally >= 8) steps for megacore + DMA pipelining."""
    budget = int(vmem_limit * 0.7)            # headroom for compiler temps
    resident = 2 * (E * w_pad * in_itemsize   # packed conv weights
                    + n_cat * 4               # conv bias
                    + S * n_cat * 4           # valid-time mask
                    + n_cat * Lp * 4          # fc weight
                    + Lp * 4)                 # fc bias
    budget = max(budget - resident, 1 << 20)
    per_row = (2 * S * E * in_itemsize        # emb block, double-buffered
               + S * w_pad * 4                # f32 matmul result u
               + 2 * S * n_cat * 4            # shift-add acc + conv temporaries
               + 2 * (Lp + cat_pad) * 4)      # lane-padded outputs (double-buffered)
    rows = max(8, budget // per_row)

    if B >= 64:
        cap = B // 8                          # plenty of steps for both TCs + pipeline
    elif B >= 16:
        cap = B // 2                          # never a single grid step
    else:
        cap = B
    rows = min(rows, max(cap, 8))

    if rows >= B:
        return B
    tb = (min(rows, B) // 8) * 8
    while tb >= 8:
        if B % tb == 0:
            return tb
        tb -= 8
    return B  # fallback: whole batch in one block


def _cnn_head_kernel(n_cat, tap_chunks, emb_ref, w_ref, b_ref, mask_ref,
                     fcw_ref, fcb_ref, logits_ref, cat_ref):
    """Conv2d(1,F,(fs,E)) + ReLU + max-over-time + concat + fc for one batch tile.

    emb_ref : [TB, S, E]     activation tile (bf16 by default)
    w_ref   : [E, Wp]        tightly packed conv taps, lane-padded to 128
    b_ref   : [1, n_cat]     conv biases (internal cat order, f32)
    mask_ref: [S, n_cat]     1.0 where the conv output position is valid
    fcw_ref : [n_cat, Lp]    fc weight (rows permuted to internal order, padded)
    fcb_ref : [1, Lp]
    logits_ref : [TB, Lp]    lane-dense outputs
    cat_ref    : [TB, CATP]
    tap_chunks : static tuple of (start_col, width) for taps k = 1..max_fs-1;
                 columns [0, n_cat) hold tap 0 of every filter group.
    """
    TB, S, E = emb_ref.shape
    rows = TB * S

    # One wide MXU matmul covering every (filter, tap): [TB*S, E] @ [E, Wp].
    x2 = emb_ref[...].reshape(rows, E)
    u = jnp.dot(x2, w_ref[...], preferred_element_type=jnp.float32)

    # Tap shift-and-add on the small result.  Filter groups are sorted by
    # descending filter size, so tap k's columns map onto the first `width`
    # lanes of the accumulator.  pltpu.roll keeps the sublane rotation on the
    # XLU slot; shift = rows - k  ==  roll by -k (row t picks tap-k from t+k).
    acc = u[:, 0:n_cat]
    for k, (col, width) in enumerate(tap_chunks, start=1):
        chunk = pltpu.roll(u[:, col:col + width], shift=rows - k, axis=0)
        if width == n_cat:
            acc = acc + chunk
        else:
            acc = jnp.concatenate([acc[:, :width] + chunk, acc[:, width:]], axis=1)

    conv = jnp.maximum(acc.reshape(TB, S, n_cat) + b_ref[...], 0.0)   # bias + ReLU
    # Invalid tail rows contain roll-wrapped values from other sequences; they
    # must be *selected out* (not multiplied) so inf/NaN can never reach the max.
    conv = jnp.where(mask_ref[...] != 0.0, conv, 0.0)
    cat = jnp.max(conv, axis=1)               # max-over-time -> [TB, n_cat]

    # Dropout is identity at inference time.
    logits = jnp.dot(cat, fcw_ref[...], preferred_element_type=jnp.float32) + fcb_ref[...]
    logits_ref[...] = logits.astype(logits_ref.dtype)

    cat_pad = cat_ref.shape[1]
    if cat_pad > n_cat:
        cat = jnp.concatenate([cat, jnp.zeros((TB, cat_pad - n_cat), cat.dtype)], axis=1)
    cat_ref[...] = cat.astype(cat_ref.dtype)


def classification_bert_cnn_forward(all_hidden, conv_ws, conv_bs, fc_w, fc_b,
                                    filter_sizes, *, compute_dtype=jnp.bfloat16,
                                    batch_tile=None):
    """all_hidden: [B, S, E] (frozen-BERT output).  conv_ws[i]: [fs_i, E, F]
    (PyTorch [F,1,fs,E] transposed), conv_bs[i]: [F], fc_w: [n*F, L] (PyTorch
    weight.T), fc_b: [L].  Returns (logits [B, L], cat [B, n*F])."""
    B, S, E = all_hidden.shape
    F = conv_ws[0].shape[-1]
    n = len(filter_sizes)
    n_cat = n * F
    L = fc_w.shape[-1]
    max_fs = max(filter_sizes)
    if S < max_fs:
        # PyTorch's Conv2d would also reject a kernel taller than the input.
        raise ValueError(f"sequence length {S} < largest filter size {max_fs}")

    Lp = _round_up(L, 128)
    cat_pad = _round_up(n_cat, 128)
    cdtype = jnp.dtype(compute_dtype)
    emb = all_hidden.astype(cdtype)

    # Internal filter-group order: descending filter size so every tap's
    # columns form a lane prefix of the internal cat order.
    order = sorted(range(n), key=lambda i: -filter_sizes[i])
    inv = [0] * n
    for p, g in enumerate(order):
        inv[g] = p
    fs_int = [filter_sizes[g] for g in order]
    ws_int = [conv_ws[g] for g in order]
    bs_int = [conv_bs[g] for g in order]

    # Tight tap packing: column block (k, p) exists only when fs_int[p] > k.
    w_cols = F * sum(filter_sizes)
    w_pad = _round_up(w_cols, 128)               # lane-dense matmul output
    w_all = jnp.zeros((E, w_pad), cdtype)
    tap_chunks = []                              # (start_col, width) for k >= 1
    col = 0
    for k in range(max_fs):
        cnt = sum(1 for fs in fs_int if fs > k)
        width = cnt * F
        for p in range(cnt):
            w_all = w_all.at[:, col + p * F:col + (p + 1) * F].set(
                ws_int[p][k].astype(cdtype))
        if k > 0:
            tap_chunks.append((col, width))
        col += width

    b_cat = jnp.concatenate(
        [jnp.reshape(b, (F,)).astype(jnp.float32) for b in bs_int]).reshape(1, n_cat)

    # Valid-time mask per filter group (conv output exists for t <= S - fs).
    t_idx = jnp.arange(S, dtype=jnp.int32)[:, None]
    limits = jnp.concatenate(
        [jnp.full((F,), S - fs, dtype=jnp.int32) for fs in fs_int])[None, :]
    mask = (t_idx <= limits).astype(jnp.float32)                       # [S, n_cat]

    # FC params: rows permuted to internal group order, lane-padded outputs.
    row_perm = np.concatenate([np.arange(F) + g * F for g in order])
    fc_w_int = jnp.asarray(fc_w, jnp.float32)[row_perm, :]
    fc_w_p = jnp.zeros((n_cat, Lp), jnp.float32).at[:, :L].set(fc_w_int)
    fc_b_p = jnp.zeros((1, Lp), jnp.float32).at[0, :L].set(
        jnp.reshape(fc_b, (L,)).astype(jnp.float32))

    vmem_limit = _vmem_limit_bytes()
    if batch_tile is not None:
        TB = batch_tile
        if B % TB != 0 or (TB != B and TB % 8 != 0):
            raise ValueError(f"batch tile {TB} incompatible with batch {B}")
    else:
        TB = _pick_batch_tile(B, S, E, w_pad, n_cat, Lp, cat_pad,
                              cdtype.itemsize, vmem_limit)

    kernel = functools.partial(_cnn_head_kernel, n_cat, tuple(tap_chunks))

    logits_p, cat_p = pl.pallas_call(
        kernel,
        grid=(B // TB,),
        in_specs=[
            pl.BlockSpec((TB, S, E), lambda i: (i, 0, 0)),   # streamed, pipelined
            pl.BlockSpec((E, w_pad), lambda i: (0, 0)),      # weights stay resident
            pl.BlockSpec((1, n_cat), lambda i: (0, 0)),
            pl.BlockSpec((S, n_cat), lambda i: (0, 0)),
            pl.BlockSpec((n_cat, Lp), lambda i: (0, 0)),
            pl.BlockSpec((1, Lp), lambda i: (0, 0)),
        ],
        out_specs=[
            pl.BlockSpec((TB, Lp), lambda i: (i, 0)),
            pl.BlockSpec((TB, cat_pad), lambda i: (i, 0)),
        ],
        out_shape=[
            jax.ShapeDtypeStruct((B, Lp), jnp.float32),
            jax.ShapeDtypeStruct((B, cat_pad), jnp.float32),
        ],
        compiler_params=pltpu.CompilerParams(
            dimension_semantics=("parallel",),     # megacore sharding on v7x
            vmem_limit_bytes=vmem_limit,           # generation-aware cap
        ),
    )(emb, w_all, b_cat, mask, fc_w_p, fc_b_p)

    # Back to the user's torch.cat column order (tiny gather outside the kernel).
    col_back = np.concatenate([np.arange(F) + inv[g] * F for g in range(n)])
    return logits_p[:, :L], cat_p[:, :n_cat][:, col_back]


def _reference_forward(all_hidden, conv_ws, conv_bs, fc_w, fc_b, filter_sizes):
    """Pure-JAX reference mirroring the PyTorch forward (dropout = identity)."""
    B, S, E = all_hidden.shape
    pooled = []
    for fs, w, b in zip(filter_sizes, conv_ws, conv_bs):
        t_out = S - fs + 1
        acc = jnp.zeros((B, t_out, w.shape[-1]), jnp.float32)
        for k in range(fs):
            acc = acc + jnp.einsum("bte,ef->btf", all_hidden[:, k:k + t_out, :], w[k])
        pooled.append(jnp.max(jax.nn.relu(acc + b[None, None, :]), axis=1))
    cat = jnp.concatenate(pooled, axis=1)
    return cat @ fc_w + fc_b[None, :], cat


if __name__ == "__main__":
    # Small synthetic shapes consistent with the module's forward.
    B, S = 16, 16           # batch, sequence length
    E = 32                  # bert hidden_size (embedding_dim), scaled down
    n_filters = 8
    filter_sizes = (2, 3, 4)
    num_labels = 4
    vocab = 50

    key = jax.random.PRNGKey(0)
    keys = jax.random.split(key, 2 + 2 * len(filter_sizes) + 2)

    # TODO(synk): the frozen BertModel forward has no clean Pallas equivalent here;
    # it is replaced by a deterministic embedding lookup producing `all_hidden`.
    emb_table = jax.random.normal(keys[0], (vocab, E), jnp.float32) * 0.1
    x = jax.random.randint(keys[1], (B, S), 0, vocab)          # token ids [B, S]
    all_hidden = emb_table[x]                                   # [B, S, E]  (glue)

    conv_ws, conv_bs = [], []
    for i, fs in enumerate(filter_sizes):
        conv_ws.append(jax.random.normal(keys[2 + 2 * i], (fs, E, n_filters), jnp.float32) * 0.1)
        conv_bs.append(jax.random.normal(keys[3 + 2 * i], (n_filters,), jnp.float32) * 0.1)
    fc_w = jax.random.normal(keys[-2], (len(filter_sizes) * n_filters, num_labels), jnp.float32) * 0.1
    fc_b = jax.random.normal(keys[-1], (num_labels,), jnp.float32) * 0.1

    ref_logits, ref_cat = _reference_forward(all_hidden, conv_ws, conv_bs, fc_w, fc_b, filter_sizes)

    # f32 streaming path, strict check (auto batch tile -> >= 2 pipelined grid steps).
    logits, cat = classification_bert_cnn_forward(
        all_hidden, conv_ws, conv_bs, fc_w, fc_b, filter_sizes,
        compute_dtype=jnp.float32)
    jax.block_until_ready((logits, cat))
    assert jnp.allclose(logits, ref_logits, rtol=1e-4, atol=1e-4)
    assert jnp.allclose(cat, ref_cat, rtol=1e-4, atol=1e-4)

    # Default path: bf16 streaming (f32 accumulation), loose tolerance.
    logits_bf, cat_bf = classification_bert_cnn_forward(
        all_hidden, conv_ws, conv_bs, fc_w, fc_b, filter_sizes)
    jax.block_until_ready((logits_bf, cat_bf))
    assert jnp.allclose(logits_bf, ref_logits, rtol=5e-2, atol=5e-2)
    assert jnp.allclose(cat_bf, ref_cat, rtol=5e-2, atol=5e-2)

    print("KERNEL_OK")
</pallas_src>

<mosaic_0001>
module attributes {stable_mosaic.version = 11 : i64} {
  func.func @_cnn_head_kernel(%arg0: i32, %arg1: memref<8x16x32xf32, #tpu.memory_space<vmem>>, %arg2: memref<32x128xf32, #tpu.memory_space<vmem>>, %arg3: memref<1x24xf32, #tpu.memory_space<vmem>>, %arg4: memref<16x24xf32, #tpu.memory_space<vmem>>, %arg5: memref<24x128xf32, #tpu.memory_space<vmem>>, %arg6: memref<1x128xf32, #tpu.memory_space<vmem>>, %arg7: memref<8x128xf32, #tpu.memory_space<vmem>>, %arg8: memref<8x128xf32, #tpu.memory_space<vmem>>) attributes {dimension_semantics = [#tpu.dimension_semantics<parallel>], iteration_bounds = array<i64: 2>, scalar_prefetch = 0 : i64, scratch_operands = 0 : i64, tpu.core_type = #tpu.core_type<tc>, window_params = [{transform_indices = @transform_0, window_bounds = array<i64: 8, 16, 32>}, {pipeline_mode = #tpu.pipeline_mode<synchronous>, transform_indices = @transform_1, window_bounds = array<i64: 32, 128>}, {pipeline_mode = #tpu.pipeline_mode<synchronous>, transform_indices = @transform_2, window_bounds = array<i64: 1, 24>}, {pipeline_mode = #tpu.pipeline_mode<synchronous>, transform_indices = @transform_3, window_bounds = array<i64: 16, 24>}, {pipeline_mode = #tpu.pipeline_mode<synchronous>, transform_indices = @transform_4, window_bounds = array<i64: 24, 128>}, {pipeline_mode = #tpu.pipeline_mode<synchronous>, transform_indices = @transform_5, window_bounds = array<i64: 1, 128>}, {transform_indices = @transform_6, window_bounds = array<i64: 8, 128>}, {transform_indices = @transform_7, window_bounds = array<i64: 8, 128>}]} {
    %c0 = arith.constant 0 : index
    %c0_0 = arith.constant 0 : index
    %c0_1 = arith.constant 0 : index
    %0 = vector.load %arg1[%c0, %c0_0, %c0_1] : memref<8x16x32xf32, #tpu.memory_space<vmem>>, vector<8x16x32xf32>
    %1 = vector.shape_cast %0 : vector<8x16x32xf32> to vector<128x32xf32>
    %c0_2 = arith.constant 0 : index
    %c0_3 = arith.constant 0 : index
    %2 = vector.load %arg2[%c0_2, %c0_3] : memref<32x128xf32, #tpu.memory_space<vmem>>, vector<32x128xf32>
    %cst = arith.constant dense<0.000000e+00> : vector<128x128xf32>
    %3 = tpu.matmul %1, %2, %cst {dimension_numbers = #tpu.dot_dimension_numbers<[1], [0], [0], [1], [0, 0, 1, 1], [], []>} : vector<128x32xf32>, vector<32x128xf32>, vector<128x128xf32> -> vector<128x128xf32>
    %4 = vector.extract_strided_slice %3 {offsets = [0, 0], sizes = [128, 24], strides = [1, 1]} : vector<128x128xf32> to vector<128x24xf32>
    %5 = vector.extract_strided_slice %3 {offsets = [0, 24], sizes = [128, 24], strides = [1, 1]} : vector<128x128xf32> to vector<128x24xf32>
    %c127_i32 = arith.constant 127 : i32
    %6 = tpu.dynamic_rotate %5 by %c127_i32 dim 0 : vector<128x24xf32>, i32 -> vector<128x24xf32>
    %7 = arith.addf %4, %6 : vector<128x24xf32>
    %8 = vector.extract_strided_slice %3 {offsets = [0, 48], sizes = [128, 16], strides = [1, 1]} : vector<128x128xf32> to vector<128x16xf32>
    %c126_i32 = arith.constant 126 : i32
    %9 = tpu.dynamic_rotate %8 by %c126_i32 dim 0 : vector<128x16xf32>, i32 -> vector<128x16xf32>
    %10 = vector.extract_strided_slice %7 {offsets = [0, 0], sizes = [128, 16], strides = [1, 1]} : vector<128x24xf32> to vector<128x16xf32>
    %11 = arith.addf %10, %9 : vector<128x16xf32>
    %12 = vector.extract_strided_slice %7 {offsets = [0, 16], sizes = [128, 8], strides = [1, 1]} : vector<128x24xf32> to vector<128x8xf32>
    %13 = tpu.concatenate %11, %12 in 1 : vector<128x16xf32>, vector<128x8xf32> -> vector<128x24xf32>
    %14 = vector.extract_strided_slice %3 {offsets = [0, 64], sizes = [128, 8], strides = [1, 1]} : vector<128x128xf32> to vector<128x8xf32>
    %c125_i32 = arith.constant 125 : i32
    %15 = tpu.dynamic_rotate %14 by %c125_i32 dim 0 : vector<128x8xf32>, i32 -> vector<128x8xf32>
    %16 = vector.extract_strided_slice %13 {offsets = [0, 0], sizes = [128, 8], strides = [1, 1]} : vector<128x24xf32> to vector<128x8xf32>
    %17 = arith.addf %16, %15 : vector<128x8xf32>
    %18 = vector.extract_strided_slice %13 {offsets = [0, 8], sizes = [128, 16], strides = [1, 1]} : vector<128x24xf32> to vector<128x16xf32>
    %19 = tpu.concatenate %17, %18 in 1 : vector<128x8xf32>, vector<128x16xf32> -> vector<128x24xf32>
    %20 = vector.shape_cast %19 : vector<128x24xf32> to vector<8x16x24xf32>
    %c0_4 = arith.constant 0 : index
    %c0_5 = arith.constant 0 : index
    %21 = vector.load %arg3[%c0_4, %c0_5] : memref<1x24xf32, #tpu.memory_space<vmem>>, vector<1x24xf32>
    %22 = vector.shape_cast %21 : vector<1x24xf32> to vector<1x1x24xf32>
    %23 = vector.broadcast %22 : vector<1x1x24xf32> to vector<8x16x24xf32>
    %24 = arith.addf %20, %23 : vector<8x16x24xf32>
    %cst_6 = arith.constant 0.000000e+00 : f32
    %25 = vector.broadcast %cst_6 : f32 to vector<8x16x24xf32>
    %26 = arith.maximumf %24, %25 : vector<8x16x24xf32>
    %c0_7 = arith.constant 0 : index
    %c0_8 = arith.constant 0 : index
    %27 = vector.load %arg4[%c0_7, %c0_8] : memref<16x24xf32, #tpu.memory_space<vmem>>, vector<16x24xf32>
    %cst_9 = arith.constant 0.000000e+00 : f32
    %28 = vector.broadcast %cst_9 : f32 to vector<16x24xf32>
    %29 = arith.cmpf one, %27, %28 : vector<16x24xf32>
    %cst_10 = arith.constant 0.000000e+00 : f32
    %30 = vector.shape_cast %29 : vector<16x24xi1> to vector<1x16x24xi1>
    %31 = vector.broadcast %30 : vector<1x16x24xi1> to vector<8x16x24xi1>
    %32 = vector.broadcast %cst_10 : f32 to vector<8x16x24xf32>
    %33 = arith.select %31, %26, %32 : vector<8x16x24xi1>, vector<8x16x24xf32>
    %cst_11 = arith.constant dense<0xFF800000> : vector<8x24xf32>
    %34 = vector.multi_reduction <maximumf>, %33, %cst_11 [1] : vector<8x16x24xf32> to vector<8x24xf32>
    %c0_12 = arith.constant 0 : index
    %c0_13 = arith.constant 0 : index
    %35 = vector.load %arg5[%c0_12, %c0_13] : memref<24x128xf32, #tpu.memory_space<vmem>>, vector<24x128xf32>
    %cst_14 = arith.constant dense<0.000000e+00> : vector<8x128xf32>
    %36 = tpu.matmul %34, %35, %cst_14 {dimension_numbers = #tpu.dot_dimension_numbers<[1], [0], [0], [1], [0, 0, 1, 1], [], []>} : vector<8x24xf32>, vector<24x128xf32>, vector<8x128xf32> -> vector<8x128xf32>
    %c0_15 = arith.constant 0 : index
    %c0_16 = arith.constant 0 : index
    %37 = vector.load %arg6[%c0_15, %c0_16] : memref<1x128xf32, #tpu.memory_space<vmem>>, vector<1x128xf32>
    %38 = vector.broadcast %37 : vector<1x128xf32> to vector<8x128xf32>
    %39 = arith.addf %36, %38 : vector<8x128xf32>
    %c0_17 = arith.constant 0 : index
    %c0_18 = arith.constant 0 : index
    %40 = vector.load %arg7[%c0_17, %c0_18] : memref<8x128xf32, #tpu.memory_space<vmem>>, vector<8x128xf32>
    tpu.vector_store %arg7[%c0_17, %c0_18], %39 {strides = array<i32>} : memref<8x128xf32, #tpu.memory_space<vmem>>, vector<8x128xf32>,
    %cst_19 = arith.constant 0.000000e+00 : f32
    %41 = vector.broadcast %cst_19 : f32 to vector<8x104xf32>
    %42 = tpu.concatenate %34, %41 in 1 : vector<8x24xf32>, vector<8x104xf32> -> vector<8x128xf32>
    %c0_20 = arith.constant 0 : index
    %c0_21 = arith.constant 0 : index
    %43 = vector.load %arg8[%c0_20, %c0_21] : memref<8x128xf32, #tpu.memory_space<vmem>>, vector<8x128xf32>
    tpu.vector_store %arg8[%c0_20, %c0_21], %42 {strides = array<i32>} : memref<8x128xf32, #tpu.memory_space<vmem>>, vector<8x128xf32>,
    return
  }
  func.func @transform_0(%arg0: i32) -> (i32, i32, i32) {
    %c0_i32 = arith.constant 0 : i32
    %c0_i32_0 = arith.constant 0 : i32
    %c0_i32_1 = arith.constant 0 : i32
    return %arg0, %c0_i32, %c0_i32_0 : i32, i32, i32
  }
  func.func @transform_1(%arg0: i32) -> (i32, i32) {
    %c0_i32 = arith.constant 0 : i32
    %c0_i32_0 = arith.constant 0 : i32
    %c0_i32_1 = arith.constant 0 : i32
    return %c0_i32, %c0_i32_0 : i32, i32
  }
  func.func @transform_2(%arg0: i32) -> (i32, i32) {
    %c0_i32 = arith.constant 0 : i32
    %c0_i32_0 = arith.constant 0 : i32
    %c0_i32_1 = arith.constant 0 : i32
    return %c0_i32, %c0_i32_0 : i32, i32
  }
  func.func @transform_3(%arg0: i32) -> (i32, i32) {
    %c0_i32 = arith.constant 0 : i32
    %c0_i32_0 = arith.constant 0 : i32
    %c0_i32_1 = arith.constant 0 : i32
    return %c0_i32, %c0_i32_0 : i32, i32
  }
  func.func @transform_4(%arg0: i32) -> (i32, i32) {
    %c0_i32 = arith.constant 0 : i32
    %c0_i32_0 = arith.constant 0 : i32
    %c0_i32_1 = arith.constant 0 : i32
    return %c0_i32, %c0_i32_0 : i32, i32
  }
  func.func @transform_5(%arg0: i32) -> (i32, i32) {
    %c0_i32 = arith.constant 0 : i32
    %c0_i32_0 = arith.constant 0 : i32
    %c0_i32_1 = arith.constant 0 : i32
    return %c0_i32, %c0_i32_0 : i32, i32
  }
  func.func @transform_6(%arg0: i32) -> (i32, i32) {
    %c0_i32 = arith.constant 0 : i32
    %c0_i32_0 = arith.constant 0 : i32
    return %arg0, %c0_i32 : i32, i32
  }
  func.func @transform_7(%arg0: i32) -> (i32, i32) {
    %c0_i32 = arith.constant 0 : i32
    %c0_i32_0 = arith.constant 0 : i32
    return %arg0, %c0_i32 : i32, i32
  }
}

</mosaic_0001>

<bundles_post_ra>
// kernel: tpu_custom_call.1
= control target key start
LH: loop header
LB: loop body
LE: loop exit
PB: predicated region body
PF: predicated region fallthrough
CT: control target
= control target key end

     0   :  { %s2591_s0 = inlined_call_operand.hbm [shape: f32[16,16,32], index: 0, kind: input, shape index: {}]   ;;  %s2592_s1 = inlined_call_operand.hbm [shape: f32[32,128], index: 1, kind: input, shape index: {}]   ;;  %s2593_s2 = inlined_call_operand.vmem [shape: f32[1,24], index: 2, kind: input, shape index: {}]   ;;  %s2594_s3 = inlined_call_operand.hbm [shape: f32[16,24], index: 3, kind: input, shape index: {}]   ;;  %s2595_s4 = inlined_call_operand.hbm [shape: f32[24,128], index: 4, kind: input, shape index: {}]   ;;  %s2596_s5 = inlined_call_operand.vmem [shape: f32[1,128], index: 5, kind: input, shape index: {}]   ;;  %s2597_s6 = inlined_call_operand.hbm [shape: f32[16,128], index: 6, kind: output, shape index: {0}]   ;;  %s2598_s7 = inlined_call_operand.hbm [shape: f32[16,128], index: 7, kind: output, shape index: {1}]  }
   0x1   :  { %2606 = sst [smem:[#allocation18_spill]] %s2592_s1 }
   0x2   :  { %13 = vsyncpa [#allocation3], 0 }
   0x3   :  { %15 = vsyncpa [#allocation3 + $0x1], 0 }
   0x4   :  { %16 = vsyncpa [#allocation6], 0 }
   0x5   :  { %17 = vsyncpa [#allocation9], 0 }
   0x6   :  { %18 = vsyncpa [#allocation4], 0 }
   0x7   :  { %20 = vsyncpa [#allocation4 + $0x1], 0 }
   0x8   :  { %21 = vsyncpa [#allocation12], 0 }
   0x9   :  { %23 = vsyncpa [#allocation12 + $0x1], 0  ;;  %s1787_s24 = smov 0   ;;  %s1789_s25 = smov 0  }
   0xa   :  { %s1791_s26 = smov 0   ;;  %s1793_s27 = smov 0  }
   0xb LB: > { %s1808_s28 = sadd.s32 4294967295, %s1732_s27   ;;  %s1318_s29 = sadd.s32 4294967294, %s1732_s27   ;;  %s1732_s27 = sphi %s1793_s27, %s2629_s27   ;;  %s1728_s26 = sphi %s1791_s26, %s2628_s26   ;;  %s1724_s25 = sphi %s1789_s25, %s2627_s25   ;;  %s1720_s24 = sphi %s1787_s24, %s2626_s24  }
   0xc   : > { %p49_p0 = scmp.ne.s32.totalorder %s1724_s25, %s1720_s24  ;;  %p2599_p1 = scmp.eq.s32.totalorder %s1808_s28, 0 }
   0xd   : > { %p178_p2 = scmp.eq.s32.totalorder %s1808_s28, 1  ;;  %p184_p3 = scmp.eq.s32.totalorder %s1318_s29, 1 }
   0xe   : > { %p1817_p4 = por %p2599_p1, %p49_p0  ;;  %p1319_p5 = scmp.ge.s32.totalorder %s1732_s27, 1 }
   0xf   : > { %p1822_p6 = por %p184_p3, %p49_p0  ;;  %p217_p7 = scmp.lt.s32.totalorder %s1732_s27, 3 }
  0x10   : > { %s2607_s30 = scalar_select %p1817_p4, 1, 0 }
  0x11   : > { %s2608_s8 = scalar_select %p1822_p6, 1, 0 }
  0x12   : > { %p1827_p8 = pnand %p1319_p5, %p217_p7  ;;  %s1734_s10 = smov [#allocation5]  }
  0x13   : > { %s229_s11 = sshll.u32 %s1734_s10, 4  ;;  %s1735_s13 = smov [#allocation7]   ;;  %s230_s11 = int_to_ptr.vmem [resolvable:$true] %s229_s11 }
  0x14   : > { %s2609_s9 = scalar_select %p1827_p8, 1, 0 }
  0x15   : > { %p1453_p9 = pneg %p1827_p8  ;;  %s245_s14 = sshll.u32 %s1735_s13, 4  ;;  %s246_s14 = int_to_ptr.vmem [resolvable:$true] %s245_s14 }
  0x16   : > { %s1736_s15 = smov [#allocation8]   ;;  %s1535_s17 = scalar_lea.vmem %s230_s11, 512 }
  0x17   : > { %p1836_p11 = pnand %p1453_p9, %p2599_p1  ;;  %s258_s16 = sshll.u32 %s1736_s15, 4  ;;  %s259_s16 = int_to_ptr.vmem [resolvable:$true] %s258_s16 }
  0x18   : > { %p1536_p13 = scmp.ne.s32.totalorder %s230_s11, %s1535_s17  ;;  %p1543_p5 = scmp.lt.s32.totalorder %s230_s11, %s230_s11 }
  0x19   : > { %p1526_p12 = pneg %p1836_p11  ;;  %p1544_p7 = scmp.lt.s32.totalorder %s1535_s17, %s1535_s17 }
  0x1b   : > { %p1538_p0 = pnand %p1536_p13, %p1526_p12  ;;  %p1545_p9 = por %p1544_p7, %p1543_p5 }
  0x1d   : > { %p1539_p3 = pneg %p1538_p0 }
  0x1f   : > { %p1546_p10 = pnand %p1545_p9, %p1539_p3 }
  0x21   : > { %1549 = shalt.err (!%p1546_p10)
}
  0x22   : > { %s2600_s18 = smov 128   ;;  %s2601_s19 = smov 8  }
  0x23   : > { %s2611_s1 = sld [smem:[#allocation18_spill]]  ;;  %s1561_s22 = scalar_lea.vmem %s246_s14, 256 }
  0x24   : > { %p1562_p13 = scmp.ne.s32.totalorder %s246_s14, %s1561_s22  ;;  %p1569_p3 = scmp.lt.s32.totalorder %s246_s14, %s246_s14 }
  0x25   : > { %p1570_p10 = scmp.lt.s32.totalorder %s1561_s22, %s1561_s22 }
  0x26   : > { %p1564_p0 = pnand %p1562_p13, %p1526_p12 }
  0x27   : > { %p1571_p7 = por %p1570_p10, %p1569_p3 }
  0x28   : > { %p1565_p5 = pneg %p1564_p0 }
  0x29   : > { %1456 = dma.hbm_to_vmem [thread:$0]  (!%p1836_p11), %s2611_s1, 512, %s230_s11, [#allocation6], %s2600_s18, %s2600_s18, %s2601_s19  }
  0x2a   : > { %p1572_p9 = pnand %p1571_p7, %p1565_p5 }
  0x2c   : > { %1575 = shalt.err (!%p1572_p9)
}
  0x2d   : > { %1459 = dma.hbm_to_vmem [thread:$0]  (!%p1836_p11), %s2594_s3, 256, %s246_s14, [#allocation6], %s2600_s18, %s2600_s18, %s2601_s19  }
  0x2e   : > { %s1587_s10 = scalar_lea.vmem %s259_s16, 384  ;;  %p1595_p3 = scmp.lt.s32.totalorder %s259_s16, %s259_s16 }
  0x2f   : > { %p1588_p1 = scmp.ne.s32.totalorder %s259_s16, %s1587_s10  ;;  %p1596_p5 = scmp.lt.s32.totalorder %s1587_s10, %s1587_s10 }
  0x31   : > { %p1590_p13 = pnand %p1588_p1, %p1526_p12  ;;  %p1597_p10 = por %p1596_p5, %p1595_p3 }
  0x33   : > { %p1591_p0 = pneg %p1590_p13 }
  0x35   : > { %p1598_p7 = pnand %p1597_p10, %p1591_p0 }
  0x37   : > { %1601 = shalt.err (!%p1598_p7)
}
  0x38   : > { %1462 = dma.hbm_to_vmem [thread:$0]  (!%p1836_p11), %s2595_s4, 384, %s259_s16, [#allocation9], %s2600_s18, %s2600_s18, %s2601_s19  }
  0x39   : > { %s1876_s14 = sadd.s32 1, %s1732_s27   ;;  %s36_s15 = sadd.s32 1, %s1728_s26 }
  0x3a   : > { %s33_s12 = ssub.s32 %s1732_s27, %s1876_s14  ;;  %p43_p12 = scmp.ne.s32.totalorder %s1728_s26, %s1724_s25 }
  0x3b   : > { %p34_p1 = scmp.eq.s32.totalorder %s33_s12, 0  ;;  %p44_p9 = scmp.eq.s32.totalorder %s1732_s27, 0 }
  0x3c   : > { %p1477_p13 = scmp.lt.s32.totalorder %s1732_s27, 2  ;;  %p1890_p3 = por %p178_p2, %p43_p12 }
  0x3d   : > { %s1886_s17 = scalar_select %p34_p1, %s1728_s26, %s36_s15  }
  0x3e   : > { %p45_p0 = por %p44_p9, %p43_p12  ;;  %s275_s21 = sand.u32 1, %s1728_s26  }
  0x3f   : > { %s2612_s20 = scalar_select %p1890_p3, 1, 0 }
  0x40   : > { %s1361_s22 = sshll.u32 %s1732_s27, 11  ;;  %s1324_s16 = sshll.u32 %s275_s21, 7 }
  0x41   : > { %s1899_s10 = scalar_lea.hbm %s2591_s0, %s1361_s22  ;;  %s279_s11 = scalar_lea.vmem [#allocation2], %s1324_s16 }
  0x42   : > { %s287_s13 = sshll.u32 %s279_s11, 4  ;;  %p1901_p11 = pnand %p1477_p13, %p45_p0  ;;  %s1905_s13 = int_to_ptr.vmem [resolvable:$true] %s287_s13 }
  0x43   : > { %s1907_s15 = scalar_lea.sflag [#allocation3], %s275_s21  ;;  %s1602_s18 = scalar_lea.hbm %s1899_s10, 2048 }
  0x44   : > { %p1603_p2 = scmp.ne.s32.totalorder %s1899_s10, %s1602_s18  ;;  %p1604_p5 = pneg %p1901_p11 }
  0x45   : > { %s1607_s16 = scalar_lea.hbm %s2591_s0, 4096  ;;  %p1608_p1 = scmp.lt.s32.totalorder %s1899_s10, %s2591_s0 }
  0x46   : > { %p1605_p10 = pnand %p1604_p5, %p1603_p2  ;;  %p1609_p12 = scmp.lt.s32.totalorder %s1607_s16, %s1602_s18 }
  0x48   : > { %p1606_p7 = pneg %p1605_p10  ;;  %p1610_p9 = por %p1609_p12, %p1608_p1 }
  0x4a   : > { %p1611_p13 = pnand %p1610_p9, %p1606_p7 }
  0x4c   : > { %1614 = shalt.err (!%p1611_p13)
}
  0x4d   : > { %s1615_s21 = scalar_lea.vmem %s1905_s13, 2048  ;;  %s1739_s19 = smov [#allocation2]  }
  0x4e   : > { %p1616_p0 = scmp.ne.s32.totalorder %s1905_s13, %s1615_s21  ;;  %s1620_s1 = sshll.u32 %s1739_s19, 4  ;;  %s1621_s1 = int_to_ptr.vmem [resolvable:$false] %s1620_s1 }
  0x4f   : > { %s1622_s22 = scalar_lea.vmem %s1621_s1, 4096  ;;  %p1623_p10 = scmp.lt.s32.totalorder %s1905_s13, %s1621_s1 }
  0x50   : > { %p1618_p6 = pnand %p1616_p0, %p1604_p5  ;;  %p1624_p3 = scmp.lt.s32.totalorder %s1622_s22, %s1615_s21 }
  0x52   : > { %p1619_p2 = pneg %p1618_p6  ;;  %p1625_p4 = por %p1624_p3, %p1623_p10 }
  0x54   : > { %p1626_p8 = pnand %p1625_p4, %p1619_p2 }
  0x56   : > { %1629 = shalt.err (!%p1626_p8)
}
  0x57   : > { %s2614_s18 = smov 8   ;;  %s2615_s23 = smov 128  }
  0x58   : > { %1466 = dma.hbm_to_vmem [thread:$0]  (!%p1901_p11), %s1899_s10, 2048, %s1905_s13, %s1907_s15, %s2615_s23, %s2615_s23, %s2614_s18  }
  0x59   : > { %p2616_p6 = scmp.ne.s32.totalorder %s2609_s9, 0 }
  0x5a   : > { %s1934_s19 = sand.u32 (!%p2616_p6), 1, %s1724_s25   ;;  %p2617_p4 = scmp.ne.s32.totalorder (!%p2616_p6), %s2607_s30, 0 }
  0x5b   : > { %299 = sbr.rel (%p2616_p6) target bundleno = 757 (0x2f5), region = 44  ;;  %s1329_s1 = sshll.u32 (!%p2616_p6), %s1934_s19, 7 }
  0x5c   : > { %s302_s16 = scalar_lea.sflag (!%p2616_p6), [#allocation3], %s1934_s19  ;;  %s1938_s29 = scalar_lea.vmem (!%p2616_p6), [#allocation2], %s1329_s1 }
  0x60   : > { %1699 = dma.done.wait (%p2617_p4), %s302_s16, 2048  }
  0x61   : > { %1701 = vsyncadd (%p2617_p4), %s302_s16, 4294965248  ;;  %p2618_p8 = scmp.eq.s32.totalorder %s1808_s28, 0 }
  0x63   : > { %1703 = dma.done.wait (%p2618_p8), [#allocation6], 768   ;;  %p2619_p3 = pmov %p2618_p8 }
  0x65   : > { %1705 = vsyncadd (%p2619_p3), [#allocation6], 4294966528  ;;  %p2620_p11 = pmov %p2619_p3 }
  0x66   : > { %p2621_p5 = pmov %p2619_p3 }
  0x67   : > { %1707 = dma.done.wait (%p2620_p11), [#allocation9], 384  }
  0x68   : > { %1709 = vsyncadd (%p2621_p5), [#allocation9], 4294966912  ;;  %v373_v0 = vld [vmem:[#allocation5 + $0x18] sm:$0xff]  ;;  %v372_v1 = vld [vmem:[#allocation5 + $0x10] sm:$0xff]  ;;  %vm374_vm0 = vcmask 261120   ;;  %s1740_s30 = smov 64   ;;  %v648_v42 = vlaneseq }
  0x69   : > { %1386 = vmatprep.subr.mxu0 %v373_v0  ;;  %1427 = vmatprep.subr.mxu1 %v373_v0  ;;  %v371_v2 = vld [vmem:[#allocation5 + $0x8] sm:$0xff]  ;;  %v354_v3 = vld [vmem:[%s1938_s29] sm:$0xff]  ;;  %v364_v6 = vld [vmem:[%s1938_s29 + $0x50] sm:$0xff]  ;;  %s1741_s9 = smov 104   ;;  %s1742_s10 = smov 80   ;;  %v1743_v37 = vmov 0.0  }
  0x6a   : > { %1387 = vmatpush3.msra.mxu0 %v373_v0  ;;  %1431 = vmatpush3.msra.mxu1 %v373_v0  ;;  %v370_v4 = vld [vmem:[#allocation5] sm:$0xff]  ;;  %v355_v5 = vld [vmem:[%s1938_s29 + $0x8] sm:$0xff]  ;;  %v356_v7 = vld [vmem:[%s1938_s29 + $0x10] sm:$0xff]  ;;  %vm1744_vm1 = vmmov 0   ;;  %v2116_v45 = vshrl.u32 %v648_v42, 7  ;;  %vm780_vm4 = vcmask 130048  }
  0x6b   : > { %1388 = vmatprep.subr.mxu0 %v372_v1  ;;  %1428 = vmatprep.subr.mxu1 %v372_v1  ;;  %v365_v8 = vld [vmem:[%s1938_s29 + $0x58] sm:$0xff]  ;;  %v366_v9 = vld [vmem:[%s1938_s29 + $0x60] sm:$0xff]  ;;  %v367_v12 = vld [vmem:[%s1938_s29 + $0x68] sm:$0xff]  ;;  %vm894_vm6 = vcmask 64512   ;;  %vm974_vm8 = vcmask 195584   ;;  %vm1065_vm10 = vcmask 1041409  }
  0x6c   : > { %1389 = vmatpush3.msra.mxu0 %v372_v1  ;;  %1432 = vmatpush3.msra.mxu1 %v372_v1  ;;  %v357_v10 = vld [vmem:[%s1938_s29 + $0x18] sm:$0xff]  ;;  %v358_v11 = vld [vmem:[%s1938_s29 + $0x20] sm:$0xff]  ;;  %v368_v13 = vld [vmem:[%s1938_s29 + $0x70] sm:$0xff]  ;;  %vm747_vm2 = vcmp.lt.s32.totalorder %v2116_v45, 6  ;;  %vm650_vm3 = vcmp.lt.s32.totalorder %v2116_v45, 7  ;;  %vm861_vm5 = vcmp.lt.s32.totalorder %v2116_v45, 5 }
  0x6d   : > { %1390 = vmatprep.subr.mxu0 %v371_v2  ;;  %1429 = vmatprep.subr.mxu1 %v371_v2  ;;  %v359_v14 = vld [vmem:[%s1938_s29 + $0x28] sm:$0xff]  ;;  %v360_v15 = vld [vmem:[%s1938_s29 + $0x30] sm:$0xff]  ;;  %v369_v16 = vld [vmem:[%s1938_s29 + $0x78] sm:$0xff]  ;;  %vm1067_vm11 = vcmask 1042434   ;;  %vm1069_vm12 = vcmask 1043459   ;;  %vm1071_vm13 = vcmask 1044484  }
  0x6e   : > { %1391 = vmatpush3.msra.mxu0 %v371_v2  ;;  %1394 = vmatprep.mubr.msk.f32.mxu0 %vm374_vm0, %v354_v3  ;;  %v361_v17 = vld [vmem:[%s1938_s29 + $0x38] sm:$0xff]  ;;  %v362_v18 = vld [vmem:[%s1938_s29 + $0x40] sm:$0xff]  ;;  %v363_v19 = vld [vmem:[%s1938_s29 + $0x48] sm:$0xff]  ;;  %vm1073_vm14 = vcmask 1045509   ;;  %vm1075_vm15 = vcmask 1046534   ;;  %s1333_s15 = sshll.u32 %s1934_s19, 3 }
  0x6f   : > { %1392 = vmatprep.subr.mxu0 %v370_v4  ;;  %1433 = vmatpush3.msra.mxu1 %v371_v2  ;;  %v1049_v36 = vld [vmem:[#allocation8 + $0x10] sm:$0xff]  ;;  %v1048_v38 = vld [vmem:[#allocation8 + $0x8] sm:$0xff]  ;;  %v1047_v39 = vld [vmem:[#allocation8] sm:$0xff]  ;;  %s352_s11 = scalar_lea.vmem [#allocation11], %s1333_s15  ;;  %s2605_s21 = sshll.u32 %s1808_s28, 7 }
  0x70   : > { %1393 = vmatpush3.msra.mxu0 %v370_v4  ;;  %1430 = vmatprep.subr.mxu1 %v370_v4  ;;  %s1185_s23 = scalar_lea.hbm %s2598_s7, %s2605_s21  ;;  %s1187_s1 = sshll.u32 %s352_s11, 4  ;;  %s1188_s1 = int_to_ptr.vmem [resolvable:$true] %s1187_s1 }
  0x71   : > { %1395 = vmatmul.mubr.msk.f32.vlgmr.msra.gmra.mxu0 %vm374_vm0, %v355_v5  ;;  %1434 = vmatpush3.msra.mxu1 %v370_v4  ;;  %s1161_s16 = scalar_lea.sflag [#allocation12], %s1934_s19  ;;  %s1630_s29 = scalar_lea.vmem %s1188_s1, 128 }
  0x72   : > { %1409 = vmatprep.mubr.msk.f32.mxu1 %vm374_vm0, %v364_v6  ;;  %1397 = vmatprep.mubr.msk.f32.mxu0 %vm374_vm0, %v356_v7  ;;  %p1631_p7 = scmp.ne.s32.totalorder %s1188_s1, %s1630_s29  ;;  %p2622_p1 = scmp.ne.s32.totalorder %s2612_s20, 0 }
  0x73   : > { %1410 = vmatmul.mubr.msk.f32.vlgmr.msra.gmra.mxu1 %vm374_vm0, %v365_v8  ;;  %1418 = vmatprep.subr.mxu1 %v1743_v37 }
  0x74   : > { %1412 = vmatprep.mubr.msk.f32.mxu1 %vm374_vm0, %v366_v9  ;;  %1419 = vmatpush3.msra.mxu1 %v1049_v36  ;;  %p1632_p12 = pnand %p1631_p7, %p2622_p1 }
  0x75   : > { %1398 = vmatmul.mubr.msk.f32.gmra.mxu0 %vm374_vm0, %v357_v10  ;;  %1420 = vmatprep.subr.mxu1 %v1743_v37 }
  0x76   : > { %1400 = vmatprep.mubr.msk.f32.mxu0 %vm374_vm0, %v358_v11  ;;  %1421 = vmatpush3.msra.mxu1 %v1048_v38  ;;  %p1633_p9 = pneg %p1632_p12 }
  0x77   : > { %1413 = vmatmul.mubr.msk.f32.gmra.mxu1 %vm374_vm0, %v367_v12  ;;  %1422 = vmatprep.subr.mxu1 %v1743_v37 }
  0x78   : > { %1415 = vmatprep.mubr.msk.f32.mxu1 %vm374_vm0, %v368_v13  ;;  %1423 = vmatpush3.msra.mxu1 %v1047_v39 }
  0x79   : > { %1401 = vmatmul.mubr.msk.f32.gmra.mxu0 %vm374_vm0, %v359_v14 }
  0x7a   : > { %1403 = vmatprep.mubr.msk.f32.mxu0 %vm374_vm0, %v360_v15 }
  0x7b   : > { %1416 = vmatmul.mubr.msk.f32.gmra.mxu1 %vm374_vm0, %v369_v16 }
  0x7c   : > { %1424 = vmatprep.mubr.msk.f32.mxu1 %vm1744_vm1, %v1743_v37 }
  0x7d   : > { %1404 = vmatmul.mubr.msk.f32.gmra.mxu0 %vm374_vm0, %v361_v17 }
  0x7e   : > { %1406 = vmatprep.mubr.msk.f32.mxu0 %vm374_vm0, %v362_v18 }
  0x81   : > { %1407 = vmatmul.mubr.msk.f32.gmra.mxu0 %vm374_vm0, %v363_v19  ;;  %vm1077_vm0 = vcmask 1047559  }
 0x131   : > { %v1984_v20 = vpop.f32.mrf.mxu0 }
 0x132   : > { %799 = vrot.lane.b32.xlu1 %v1984_v20, %s1740_s30  ;;  %586 = vrot.lane.b32.xlu0 %v1984_v20, %s1741_s9 }
 0x133   : > { %v1990_v21 = vpop.f32.mrf.mxu1  ;;  %v1996_v22 = vpop.f32.mrf.mxu0 }
 0x135   : > { %v2002_v23 = vpop.f32.mrf.mxu1  ;;  %v2012_v24 = vpop.f32.mrf.mxu0 }
 0x136   : > { %819 = vrot.lane.b32.xlu1 %v1990_v21, %s1740_s30  ;;  %685 = vrot.lane.b32.xlu0 %v1984_v20, %s1742_s10 }
 0x137   : > { %v2022_v25 = vpop.f32.mrf.mxu0  ;;  %v2028_v26 = vpop.f32.mrf.mxu1 }
 0x139   : > { %v2034_v27 = vpop.f32.mrf.mxu1  ;;  %v2044_v28 = vpop.f32.mrf.mxu0 }
 0x13a   : > { %606 = vrot.lane.b32.xlu0 %v1990_v21, %s1741_s9  ;;  %683 = vrot.lane.b32.xlu1 %v1996_v22, %s1742_s10 }
 0x13b   : > { %v2050_v29 = vpop.f32.mrf.mxu1  ;;  %v2056_v30 = vpop.f32.mrf.mxu0 }
 0x13d   : > { %v2062_v31 = vpop.f32.mrf.mxu1  ;;  %v2072_v32 = vpop.f32.mrf.mxu0 }
 0x13e   : > { %705 = vrot.lane.b32.xlu0 %v1990_v21, %s1742_s10  ;;  %604 = vrot.lane.b32.xlu1 %v2002_v23, %s1741_s9 }
 0x13f   : > { %v2078_v33 = vpop.f32.mrf.mxu0 }
 0x141   : > { %v2088_v34 = vpop.f32.mrf.mxu0 }
 0x142   : > { %703 = vrot.lane.b32.xlu1 %v2002_v23, %s1742_s10  ;;  %584 = vrot.lane.b32.xlu0 %v1996_v22, %s1741_s9 }
 0x143   : > { %v2098_v35 = vpop.f32.mrf.mxu0 }
 0x146   : > { %797 = vrot.lane.b32.xlu0 %v1996_v22, %s1740_s30  ;;  %590 = vrot.lane.b32.xlu1 %v2012_v24, %s1741_s9 }
 0x14a   : > { %817 = vrot.lane.b32.xlu0 %v2002_v23, %s1740_s30  ;;  %803 = vrot.lane.b32.xlu1 %v2012_v24, %s1740_s30 }
 0x14e   : > { %689 = vrot.lane.b32.xlu0 %v2012_v24, %s1742_s10  ;;  %588 = vrot.lane.b32.xlu1 %v2022_v25, %s1741_s9 }
 0x152   : > { %610 = vrot.lane.b32.xlu0 %v2028_v26, %s1741_s9  ;;  %687 = vrot.lane.b32.xlu1 %v2022_v25, %s1742_s10 }
 0x156   : > { %709 = vrot.lane.b32.xlu0 %v2028_v26, %s1742_s10  ;;  %608 = vrot.lane.b32.xlu1 %v2034_v27, %s1741_s9 }
 0x15a   : > { %801 = vrot.lane.b32.xlu0 %v2022_v25, %s1740_s30  ;;  %707 = vrot.lane.b32.xlu1 %v2034_v27, %s1742_s10 }
 0x15e   : > { %693 = vrot.lane.b32.xlu0 %v2044_v28, %s1742_s10  ;;  %594 = vrot.lane.b32.xlu1 %v2044_v28, %s1741_s9 }
 0x162   : > { %807 = vrot.lane.b32.xlu0 %v2044_v28, %s1740_s30  ;;  %614 = vrot.lane.b32.xlu1 %v2050_v29, %s1741_s9 }
 0x166   : > { %713 = vrot.lane.b32.xlu0 %v2050_v29, %s1742_s10  ;;  %691 = vrot.lane.b32.xlu1 %v2056_v30, %s1742_s10 }
 0x16a   : > { %612 = vrot.lane.b32.xlu1 %v2062_v31, %s1741_s9  ;;  %592 = vrot.lane.b32.xlu0 %v2056_v30, %s1741_s9 }
 0x16e   : > { %711 = vrot.lane.b32.xlu1 %v2062_v31, %s1742_s10  ;;  %805 = vrot.lane.b32.xlu0 %v2056_v30, %s1740_s30 }
 0x172   : > { %697 = vrot.lane.b32.xlu0 %v2072_v32, %s1742_s10  ;;  %598 = vrot.lane.b32.xlu1 %v2072_v32, %s1741_s9 }
 0x176   : > { %811 = vrot.lane.b32.xlu0 %v2072_v32, %s1740_s30  ;;  %695 = vrot.lane.b32.xlu1 %v2078_v33, %s1742_s10 }
 0x17a   : > { %809 = vrot.lane.b32.xlu1 %v2078_v33, %s1740_s30  ;;  %596 = vrot.lane.b32.xlu0 %v2078_v33, %s1741_s9 }
 0x17e   : > { %815 = vrot.lane.b32.xlu1 %v2088_v34, %s1740_s30  ;;  %602 = vrot.lane.b32.xlu0 %v2088_v34, %s1741_s9 }
 0x182   : > { %823 = vrot.lane.b32.xlu1 %v2028_v26, %s1740_s30  ;;  %701 = vrot.lane.b32.xlu0 %v2088_v34, %s1742_s10 }
 0x186   : > { %699 = vrot.lane.b32.xlu1 %v2098_v35, %s1742_s10  ;;  %600 = vrot.lane.b32.xlu0 %v2098_v35, %s1741_s9 }
 0x18a   : > { %813 = vrot.lane.b32.xlu1 %v2098_v35, %s1740_s30  ;;  %821 = vrot.lane.b32.xlu0 %v2034_v27, %s1740_s30 }
 0x18e   : > { %827 = vrot.lane.b32.xlu1 %v2050_v29, %s1740_s30  ;;  %825 = vrot.lane.b32.xlu0 %v2062_v31, %s1740_s30  ;;  %s1745_s30 = smov [#allocation11]  }
 0x18f   : > { %s1634_s9 = sshll.u32 %s1745_s30, 4  ;;  %s1635_s9 = int_to_ptr.vmem [resolvable:$false] %s1634_s9 }
 0x190   : > { %s1636_s10 = scalar_lea.vmem %s1635_s9, 256  ;;  %p1637_p13 = scmp.lt.s32.totalorder %s1188_s1, %s1635_s9 }
 0x191   : > { %p1638_p0 = scmp.lt.s32.totalorder %s1636_s10, %s1630_s29 }
 0x193   : > { %p1639_p2 = por %p1638_p0, %p1637_p13 }
 0x195   : > { %p1640_p10 = pnand %p1639_p2, %p1633_p9 }
 0x1a4   : > { %v2112_v40 = vpop.permute.xlu1 %799  ;;  %v587_v41 = vpop.permute.xlu0 %586 }
 0x1a5   : > { %v633_v58 = vrot.slane %v587_v41, 1  ;;  %v846_v5 = vrot.slane %v2112_v40, 3 }
 0x1a8   : > { %v2114_v43 = vpop.permute.xlu1 %819  ;;  %v686_v44 = vpop.permute.xlu0 %685 }
 0x1a9   : > { %v732_v48 = vrot.slane %v686_v44, 2  ;;  %v856_v13 = vrot.slane %v2114_v43, 3 }
 0x1ac   : > { %v607_v46 = vpop.permute.xlu0 %606  ;;  %v2119_v47 = vpop.permute.xlu1 %683 }
 0x1ad   : > { %v731_v49 = vrot.slane %v2119_v47, 2  ;;  %v643_v53 = vrot.slane %v607_v46, 1 }
 0x1af   : > { %v762_v50 = vsel %vm747_vm2, %v731_v49, %v732_v48 }
 0x1b0   : > { %v2126_v51 = vpop.permute.xlu0 %705  ;;  %v2129_v52 = vpop.permute.xlu1 %604 }
 0x1b1   : > { %v642_v54 = vrot.slane %v2129_v52, 1  ;;  %v742_v59 = vrot.slane %v2126_v51, 2 }
 0x1b3   : > { %v655_v55 = vsel %vm650_vm3, %v642_v54, %v643_v53 }
 0x1b4   : > { %v2136_v56 = vpop.permute.xlu1 %703  ;;  %v2138_v57 = vpop.permute.xlu0 %584  ;;  %v677_v62 = vadd.f32 %v655_v55, %v2002_v23  ;;  %v2199_v55 = vld [vmem:[%s2593_s2] ss:$0 sm:$0xff] }
 0x1b5   : > { %v741_v60 = vrot.slane %v2136_v56, 2  ;;  %v632_v61 = vrot.slane %v2138_v57, 1 }
 0x1b7   : > { %v752_v63 = vsel %vm747_vm2, %v741_v60, %v742_v59  ;;  %v665_v0 = vsel %vm650_vm3, %v632_v61, %v633_v58 }
 0x1b8   : > { %v774_v1 = vadd.f32 %v752_v63, %v677_v62  ;;  %v667_v2 = vadd.f32 %v665_v0, %v1996_v22  ;;  %v2154_v3 = vpop.permute.xlu0 %797  ;;  %v2156_v4 = vpop.permute.xlu1 %590 }
 0x1b9   : > { %v845_v6 = vrot.slane %v2154_v3, 3 }
 0x1ba   : > { %v764_v7 = vadd.f32 %v762_v50, %v667_v2  ;;  %v791_v8 = vsel %vm780_vm4, %v774_v1, %v677_v62 }
 0x1bb   : > { %v876_v9 = vsel %vm861_vm5, %v845_v6, %v846_v5 }
 0x1bc   : > { %v781_v10 = vsel %vm780_vm4, %v764_v7, %v667_v2  ;;  %v2166_v11 = vpop.permute.xlu0 %817  ;;  %v2168_v12 = vpop.permute.xlu1 %803  ;;  %v2210_v2 = vld [vmem:[#allocation7] sm:$0xff] }
 0x1bd   : > { %v878_v14 = vadd.f32 %v876_v9, %v781_v10  ;;  %v855_v15 = vrot.slane %v2166_v11, 3  ;;  %v635_v9 = vrot.slane %v2156_v4, 1  ;;  %vm952_vm7 = vcmp.ne.f32.partialorder %v2210_v2, 0.0 }
 0x1bf   : > { %v895_v16 = vsel %vm894_vm6, %v878_v14, %v781_v10  ;;  %v866_v17 = vsel %vm861_vm5, %v855_v15, %v856_v13 }
 0x1c0   : > { %v888_v18 = vadd.f32 %v866_v17, %v791_v8  ;;  %v2179_v19 = vpop.permute.xlu0 %689  ;;  %v589_v22 = vpop.permute.xlu1 %588  ;;  %v918_v63 = vadd.f32 %v2199_v55, %v895_v16 }
 0x1c1   : > { %v634_v23 = vrot.slane %v589_v22, 1 }
 0x1c2   : > { %v2182_v36 = vsel %vm894_vm6, %v888_v18, %v791_v8  ;;  %v934_v18 = vmax.f32 %v918_v63, 0.0 }
 0x1c3   : > { %v664_v37 = vsel %vm650_vm3, %v633_v58, %v634_v23  ;;  %v663_v22 = vsel %vm650_vm3, %v634_v23, %v635_v9 }
 0x1c4   : > { %v2186_v38 = vpop.permute.xlu0 %610  ;;  %v688_v39 = vpop.permute.xlu1 %687  ;;  %v668_v41 = vadd.f32 %v1984_v20, %v664_v37  ;;  %v669_v23 = vadd.f32 %v663_v22, %v2022_v25 }
 0x1c5   : > { %v733_v40 = vrot.slane %v688_v39, 2 }
 0x1c7   : > { %v761_v42 = vsel %vm747_vm2, %v732_v48, %v733_v40 }
 0x1c8   : > { %v765_v44 = vadd.f32 %v761_v42, %v668_v41  ;;  %v2191_v46 = vpop.permute.xlu0 %709  ;;  %v2193_v50 = vpop.permute.xlu1 %608 }
 0x1c9   : > { %v644_v51 = vrot.slane %v2193_v50, 1 }
 0x1ca   : > { %v782_v58 = vsel %vm780_vm4, %v765_v44, %v668_v41 }
 0x1cb   : > { %v654_v20 = vsel %vm650_vm3, %v643_v53, %v644_v51 }
 0x1cc   : > { %v802_v48 = vpop.permute.xlu0 %801  ;;  %v2206_v62 = vpop.permute.xlu1 %707  ;;  %v678_v7 = vadd.f32 %v1990_v21, %v654_v20  ;;  %v2225_v21 = vld [vmem:[#allocation7 + $0x8] sm:$0xff]  ;;  %v848_v20 = vrot.slane %v2168_v12, 3 }
 0x1cd   : > { %v847_v0 = vrot.slane %v802_v48, 3  ;;  %v743_v1 = vrot.slane %v2206_v62, 2  ;;  %vm953_vm9 = vcmp.ne.f32.partialorder %v2225_v21, 0.0 }
 0x1cf   : > { %v875_v8 = vsel %vm861_vm5, %v846_v5, %v847_v0  ;;  %v751_v53 = vsel %vm747_vm2, %v742_v59, %v743_v1  ;;  %v734_v5 = vrot.slane %v2179_v19, 2  ;;  %v958_v19 = vsel %vm952_vm7, %v934_v18, 0.0 }
 0x1d0   : > { %v879_v10 = vadd.f32 %v875_v8, %v782_v58  ;;  %v775_v14 = vadd.f32 %v751_v53, %v678_v7  ;;  %v2220_v16 = vpop.permute.xlu0 %693  ;;  %v2222_v17 = vpop.permute.xlu1 %594  ;;  %v874_v12 = vsel %vm861_vm5, %v847_v0, %v848_v20 }
 0x1d1   : > { %v760_v39 = vsel %vm747_vm2, %v733_v40, %v734_v5  ;;  %v637_v0 = vrot.slane %v2222_v17, 1 }
 0x1d2   : > { %v896_v59 = vsel %vm894_vm6, %v879_v10, %v782_v58  ;;  %v2232_v4 = vsel %vm780_vm4, %v775_v14, %v678_v7  ;;  %v766_v48 = vadd.f32 %v760_v39, %v669_v23  ;;  %v975_v7 = vsel %vm974_vm8, %v958_v19, -inf }
 0x1d3   : > { %v919_v37 = vadd.f32 %v2199_v55, %v896_v59 }
 0x1d4   : > { %v2238_v41 = vpop.permute.xlu0 %807  ;;  %v2240_v42 = vpop.permute.xlu1 %614  ;;  %v783_v18 = vsel %vm780_vm4, %v766_v48, %v669_v23  ;;  %v736_v23 = vrot.slane %v2220_v16, 2 }
 0x1d5   : > { %v935_v44 = vmax.f32 %v919_v37, 0.0  ;;  %v647_v58 = vrot.slane %v2240_v42, 1  ;;  %v880_v22 = vadd.f32 %v874_v12, %v783_v18 }
 0x1d7   : > { %v959_v40 = vsel %vm953_vm9, %v935_v44, 0.0  ;;  %v666_v63 = vsel %vm650_vm3, %v647_v58, %v632_v61  ;;  %v897_v48 = vsel %vm894_vm6, %v880_v22, %v783_v18 }
 0x1d8   : > { %v976_v25 = vsel %vm974_vm8, %v959_v40, -inf  ;;  %v2257_v8 = vpop.permute.xlu0 %713  ;;  %v692_v53 = vpop.permute.xlu1 %691  ;;  %v682_v57 = vadd.f32 %v2050_v29, %v666_v63 }
 0x1d9   : > { %v977_v10 = vmax.f32 %v975_v7, %v976_v25  ;;  %v746_v14 = vrot.slane %v2257_v8, 2  ;;  %v735_v19 = vrot.slane %v692_v53, 2 }
 0x1db   : > { %v763_v61 = vsel %vm747_vm2, %v746_v14, %v731_v49  ;;  %v928_v49 = vadd.f32 %v2199_v55, %v2182_v36  ;;  %v758_v53 = vsel %vm747_vm2, %v735_v19, %v736_v23  ;;  %v759_v36 = vsel %vm747_vm2, %v734_v5, %v735_v19 }
 0x1dc   : > { %v779_v59 = vadd.f32 %v763_v61, %v682_v57  ;;  %v2270_v37 = vpop.permute.xlu1 %612  ;;  %v593_v39 = vpop.permute.xlu0 %592  ;;  %v920_v61 = vadd.f32 %v2199_v55, %v897_v48  ;;  %v978_v19 = vrot.slane %v977_v10, 4 }
 0x1dd   : > { %v636_v44 = vrot.slane %v593_v39, 1  ;;  %v944_v22 = vmax.f32 %v928_v49, 0.0  ;;  %v645_v49 = vrot.slane %v2186_v38, 1  ;;  %v646_v50 = vrot.slane %v2270_v37, 1 }
 0x1de   : > { %v2274_v29 = vsel %vm780_vm4, %v779_v59, %v682_v57  ;;  %v979_v38 = vmax.f32 %v977_v10, %v978_v19 }
 0x1df   : > { %v661_v47 = vsel %vm650_vm3, %v636_v44, %v637_v0  ;;  %v662_v40 = vsel %vm650_vm3, %v635_v9, %v636_v44  ;;  %v850_v9 = vrot.slane %v2238_v41, 3 }
 0x1e0   : > { %v671_v63 = vadd.f32 %v661_v47, %v2056_v30  ;;  %v2287_v7 = vpop.permute.xlu1 %711  ;;  %v806_v25 = vpop.permute.xlu0 %805  ;;  %v670_v12 = vadd.f32 %v2012_v24, %v662_v40  ;;  %v936_v40 = vmax.f32 %v920_v61, 0.0 }
 0x1e1   : > { %v849_v57 = vrot.slane %v806_v25, 3 }
 0x1e2   : > { %v768_v18 = vadd.f32 %v758_v53, %v671_v63  ;;  %v767_v30 = vadd.f32 %v759_v36, %v670_v12  ;;  %v960_v61 = vsel %vm952_vm7, %v936_v40, 0.0 }
 0x1e3   : > { %v872_v24 = vsel %vm861_vm5, %v849_v57, %v850_v9  ;;  %v873_v5 = vsel %vm861_vm5, %v848_v20, %v849_v57  ;;  %v653_v20 = vsel %vm650_vm3, %v644_v51, %v645_v49  ;;  %v984_v40 = vsel %vm974_vm8, %v960_v61, -inf }
 0x1e4   : > { %v2298_v59 = vpop.permute.xlu0 %697  ;;  %v2300_v39 = vpop.permute.xlu1 %598  ;;  %v784_v44 = vsel %vm780_vm4, %v767_v30, %v670_v12  ;;  %v785_v47 = vsel %vm780_vm4, %v768_v18, %v671_v63  ;;  %v968_v63 = vsel %vm952_vm7, %v944_v22, 0.0  ;;  %v744_v18 = vrot.slane %v2191_v46, 2 }
 0x1e5   : > { %v881_v48 = vadd.f32 %v873_v5, %v784_v44  ;;  %v882_v25 = vadd.f32 %v872_v24, %v785_v47  ;;  %v2329_v22 = vsel %vm974_vm8, %v968_v63, -inf  ;;  %v679_v46 = vadd.f32 %v653_v20, %v2034_v27 }
 0x1e6   : > { %v750_v30 = vsel %vm747_vm2, %v743_v1, %v744_v18  ;;  %v639_v62 = vrot.slane %v2300_v39, 1  ;;  %v980_v1 = vrot.slane %v979_v38, 2  ;;  %v745_v63 = vrot.slane %v2287_v7, 2 }
 0x1e7   : > { %v898_v53 = vsel %vm894_vm6, %v881_v48, %v784_v44  ;;  %v899_v51 = vsel %vm894_vm6, %v882_v25, %v785_v47  ;;  %v738_v47 = vrot.slane %v2298_v59, 2 }
 0x1e8   : > { %v2312_v36 = vpop.permute.xlu0 %811  ;;  %v696_v12 = vpop.permute.xlu1 %695  ;;  %v921_v57 = vadd.f32 %v2199_v55, %v898_v53  ;;  %v776_v53 = vadd.f32 %v750_v30, %v679_v46  ;;  %v922_v27 = vadd.f32 %v2199_v55, %v899_v51  ;;  %v2400_v41 = vmax.f32 %v979_v38, %v980_v1 }
 0x1e9   : > { %v737_v19 = vrot.slane %v696_v12, 2  ;;  %v652_v12 = vsel %vm650_vm3, %v645_v49, %v646_v50 }
 0x1ea   : > { %v937_v44 = vmax.f32 %v921_v57, 0.0 }
 0x1eb   : > { %v756_v49 = vsel %vm747_vm2, %v737_v19, %v738_v47 }
 0x1ec   : > { %v810_v24 = vpop.permute.xlu1 %809  ;;  %v597_v10 = vpop.permute.xlu0 %596  ;;  %v961_v5 = vsel %vm953_vm9, %v937_v44, 0.0  ;;  %v651_v44 = vsel %vm650_vm3, %v646_v50, %v647_v58  ;;  %v749_v58 = vsel %vm747_vm2, %v744_v18, %v745_v63  ;;  %v938_v50 = vmax.f32 %v922_v27, 0.0 }
 0x1ed   : > { %v638_v48 = vrot.slane %v597_v10, 1  ;;  %v985_v37 = vsel %vm974_vm8, %v961_v5, -inf  ;;  %v851_v20 = vrot.slane %v810_v24, 3  ;;  %v680_v10 = vadd.f32 %v2028_v26, %v652_v12 }
 0x1ee   : > { %v986_v24 = vmax.f32 %v984_v40, %v985_v37  ;;  %v962_v12 = vsel %vm952_vm7, %v938_v50, 0.0 }
 0x1ef   : > { %v659_v25 = vsel %vm650_vm3, %v638_v48, %v639_v62  ;;  %v660_v7 = vsel %vm650_vm3, %v637_v0, %v638_v48  ;;  %v852_v0 = vrot.slane %v2312_v36, 3  ;;  %v2373_v48 = vadd.f32 %v651_v44, %v2062_v31 }
 0x1f0   : > { %v673_v57 = vadd.f32 %v659_v25, %v2078_v33  ;;  %v2353_v61 = vpop.permute.xlu1 %815  ;;  %v603_v30 = vpop.permute.xlu0 %602  ;;  %v672_v17 = vadd.f32 %v2044_v28, %v660_v7  ;;  %v757_v33 = vsel %vm747_vm2, %v736_v23, %v737_v19  ;;  %v748_v31 = vsel %vm747_vm2, %v745_v63, %v746_v14 }
 0x1f1   : > { %v641_v51 = vrot.slane %v603_v30, 1  ;;  %v870_v28 = vsel %vm861_vm5, %v851_v20, %v852_v0  ;;  %v871_v19 = vsel %vm861_vm5, %v850_v9, %v851_v20  ;;  %v777_v52 = vadd.f32 %v749_v58, %v680_v10 }
 0x1f2   : > { %v770_v42 = vadd.f32 %v756_v49, %v673_v57  ;;  %v769_v5 = vadd.f32 %v757_v33, %v672_v17  ;;  %v987_v37 = vrot.slane %v986_v24, 4  ;;  %v854_v8 = vrot.slane %v2353_v61, 3 }
 0x1f3   : > { %v656_v26 = vsel %vm650_vm3, %v641_v51, %v642_v54  ;;  %v793_v14 = vsel %vm780_vm4, %v776_v53, %v679_v46  ;;  %v778_v9 = vadd.f32 %v748_v31, %v2373_v48  ;;  %v993_v38 = vsel %vm974_vm8, %v962_v12, -inf }
 0x1f4   : > { %v787_v16 = vsel %vm780_vm4, %v770_v42, %v673_v57  ;;  %v2384_v23 = vpop.permute.xlu1 %823  ;;  %v702_v18 = vpop.permute.xlu0 %701  ;;  %v786_v40 = vsel %vm780_vm4, %v769_v5, %v672_v17  ;;  %v676_v7 = vadd.f32 %v2088_v34, %v656_v26  ;;  %v988_v46 = vmax.f32 %v986_v24, %v987_v37 }
 0x1f5   : > { %v884_v27 = vadd.f32 %v870_v28, %v787_v16  ;;  %v883_v25 = vadd.f32 %v871_v19, %v786_v40  ;;  %v740_v54 = vrot.slane %v702_v18, 2  ;;  %v2412_v53 = vsel %vm780_vm4, %v777_v52, %v680_v10 }
 0x1f6   : > { %v867_v56 = vsel %vm861_vm5, %v854_v8, %v855_v15 }
 0x1f7   : > { %v900_v63 = vsel %vm894_vm6, %v883_v25, %v786_v40  ;;  %v753_v20 = vsel %vm747_vm2, %v740_v54, %v741_v60  ;;  %v901_v44 = vsel %vm894_vm6, %v884_v27, %v787_v16  ;;  %v858_v60 = vrot.slane %v2384_v23, 3 }
 0x1f8   : > { %v700_v57 = vpop.permute.xlu1 %699  ;;  %v601_v30 = vpop.permute.xlu0 %600  ;;  %v923_v61 = vadd.f32 %v2199_v55, %v900_v63  ;;  %v773_v34 = vadd.f32 %v753_v20, %v676_v7  ;;  %v924_v42 = vadd.f32 %v2199_v55, %v901_v44 }
 0x1f9   : > { %v739_v49 = vrot.slane %v700_v57, 2  ;;  %v640_v1 = vrot.slane %v601_v30, 1  ;;  %v795_v57 = vsel %vm780_vm4, %v778_v9, %v2373_v48 }
 0x1fa   : > { %v939_v17 = vmax.f32 %v923_v61, 0.0  ;;  %v790_v33 = vsel %vm780_vm4, %v773_v34, %v676_v7 }
 0x1fb   : > { %v887_v58 = vadd.f32 %v867_v56, %v790_v33  ;;  %v754_v24 = vsel %vm747_vm2, %v739_v49, %v740_v54  ;;  %v657_v10 = vsel %vm650_vm3, %v640_v1, %v641_v51  ;;  %v755_v15 = vsel %vm747_vm2, %v738_v47, %v739_v49 }
 0x1fc   : > { %v814_v50 = vpop.permute.xlu1 %813  ;;  %v822_v5 = vpop.permute.xlu0 %821  ;;  %v963_v11 = vsel %vm953_vm9, %v939_v17, 0.0  ;;  %v658_v28 = vsel %vm650_vm3, %v639_v62, %v640_v1  ;;  %v675_v16 = vadd.f32 %v657_v10, %v2098_v35  ;;  %v940_v47 = vmax.f32 %v924_v42, 0.0 }
 0x1fd   : > { %v994_v26 = vsel %vm974_vm8, %v963_v11, -inf  ;;  %v904_v51 = vsel %vm894_vm6, %v887_v58, %v790_v33  ;;  %v674_v18 = vadd.f32 %v2072_v32, %v658_v28  ;;  %v853_v31 = vrot.slane %v814_v50, 3 }
 0x1fe   : > { %v995_v19 = vmax.f32 %v993_v38, %v994_v26  ;;  %v927_v59 = vadd.f32 %v2199_v55, %v904_v51  ;;  %v772_v40 = vadd.f32 %v754_v24, %v675_v16  ;;  %v857_v27 = vrot.slane %v822_v5, 3 }
 0x1ff   : > { %v771_v52 = vadd.f32 %v755_v15, %v674_v18  ;;  %v868_v39 = vsel %vm861_vm5, %v853_v31, %v854_v8  ;;  %v869_v35 = vsel %vm861_vm5, %v852_v0, %v853_v31  ;;  %v989_v0 = vrot.slane %v988_v46, 2 }
 0x200   : > { %v996_v62 = vrot.slane %v995_v19, 4  ;;  %v943_v37 = vmax.f32 %v927_v59, 0.0  ;;  %v789_v32 = vsel %vm780_vm4, %v772_v40, %v675_v16  ;;  %v864_v25 = vsel %vm861_vm5, %v857_v27, %v858_v60  ;;  %v828_v54 = vpop.permute.xlu1 %827  ;;  %v826_v43 = vpop.permute.xlu0 %825 }
 0x201   : > { %v788_v12 = vsel %vm780_vm4, %v771_v52, %v674_v18  ;;  %v886_v7 = vadd.f32 %v868_v39, %v789_v32  ;;  %v865_v36 = vsel %vm861_vm5, %v856_v13, %v857_v27  ;;  %v890_v8 = vadd.f32 %v864_v25, %v793_v14 }
 0x202   : > { %v885_v63 = vadd.f32 %v869_v35, %v788_v12  ;;  %v889_v20 = vadd.f32 %v865_v36, %v2232_v4  ;;  %v964_v30 = vsel %vm952_vm7, %v940_v47, 0.0  ;;  %v860_v34 = vrot.slane %v828_v54, 3 }
 0x203   : > { %v903_v44 = vsel %vm894_vm6, %v886_v7, %v789_v32  ;;  %v907_v61 = vsel %vm894_vm6, %v890_v8, %v793_v14  ;;  %v997_v49 = vmax.f32 %v995_v19, %v996_v62  ;;  %v967_v48 = vsel %vm953_vm9, %v943_v37, 0.0 }
 0x204   : > { %v902_v13 = vsel %vm894_vm6, %v885_v63, %v788_v12  ;;  %v926_v38 = vadd.f32 %v2199_v55, %v903_v44  ;;  %v906_v1 = vsel %vm894_vm6, %v889_v20, %v2232_v4  ;;  %v877_v14 = vsel %vm861_vm5, %v860_v34, %v845_v6 }
 0x205   : > { %v925_v9 = vadd.f32 %v2199_v55, %v902_v13  ;;  %v929_v17 = vadd.f32 %v2199_v55, %v906_v1  ;;  %v930_v33 = vadd.f32 %v2199_v55, %v907_v61  ;;  %v893_v42 = vadd.f32 %v877_v14, %v2274_v29 }
 0x206   : > { %v942_v56 = vmax.f32 %v926_v38, 0.0  ;;  %v859_v58 = vrot.slane %v826_v43, 3  ;;  %v990_v24 = vmax.f32 %v988_v46, %v989_v0  ;;  %v1002_v4 = vsel %vm974_vm8, %v964_v30, -inf }
 0x207   : > { %v941_v10 = vmax.f32 %v925_v9, 0.0  ;;  %v945_v50 = vmax.f32 %v929_v17, 0.0  ;;  %v998_v5 = vrot.slane %v997_v49, 2  ;;  %v1012_v11 = vsel %vm974_vm8, %v967_v48, -inf }
 0x208   : > { %v966_v3 = vsel %vm952_vm7, %v942_v56, 0.0  ;;  %v910_v6 = vsel %vm894_vm6, %v893_v42, %v2274_v29  ;;  %v862_v16 = vsel %vm861_vm5, %v859_v58, %v860_v34  ;;  %v946_v18 = vmax.f32 %v930_v33, 0.0 }
 0x209   : > { %v965_v15 = vsel %vm953_vm9, %v941_v10, 0.0  ;;  %v1011_v28 = vsel %vm974_vm8, %v966_v3, -inf  ;;  %v969_v46 = vsel %vm953_vm9, %v945_v50, 0.0  ;;  %v933_v59 = vadd.f32 %v2199_v55, %v910_v6 }
 0x20a   : > { %v1003_v26 = vsel %vm974_vm8, %v965_v15, -inf  ;;  %v1013_v51 = vmax.f32 %v1011_v28, %v1012_v11  ;;  %v1021_v31 = vsel %vm974_vm8, %v969_v46, -inf  ;;  %v863_v40 = vsel %vm861_vm5, %v858_v60, %v859_v58 }
 0x20b   : > { %v1004_v19 = vmax.f32 %v1002_v4, %v1003_v26  ;;  %v1022_v29 = vmax.f32 %v2329_v22, %v1021_v31  ;;  %v999_v27 = vmax.f32 %v997_v49, %v998_v5  ;;  %v891_v52 = vadd.f32 %v863_v40, %v2412_v53 }
 0x20c   : > { %v1014_v47 = vrot.slane %v1013_v51, 4  ;;  %v892_v39 = vadd.f32 %v862_v16, %v795_v57  ;;  %v982_v35 = vrot.slane %v2400_v41, 1  ;;  %v949_v32 = vmax.f32 %v933_v59, 0.0 }
 0x20d   : > { %v1005_v62 = vrot.slane %v1004_v19, 4  ;;  %v1023_v37 = vrot.slane %v1022_v29, 4  ;;  %v991_v22 = vrot.slane %v990_v24, 1  ;;  %v908_v23 = vsel %vm894_vm6, %v891_v52, %v2412_v53 }
 0x20e   : > { %v1015_v25 = vmax.f32 %v1013_v51, %v1014_v47  ;;  %v909_v45 = vsel %vm894_vm6, %v892_v39, %v795_v57  ;;  %v970_v54 = vsel %vm952_vm7, %v946_v18, 0.0  ;;  %v931_v7 = vadd.f32 %v2199_v55, %v908_v23 }
 0x20f   : > { %v1006_v60 = vmax.f32 %v1004_v19, %v1005_v62  ;;  %v1024_v12 = vmax.f32 %v1022_v29, %v1023_v37  ;;  %v1000_v36 = vrot.slane %v999_v27, 1  ;;  %v973_v0 = vsel %vm953_vm9, %v949_v32, 0.0 }
 0x210   : > { %v1016_v8 = vrot.slane %v1015_v25, 2  ;;  %v932_v63 = vadd.f32 %v2199_v55, %v909_v45  ;;  %v983_v20 = vmax.f32 %v2400_v41, %v982_v35  ;;  %v947_v44 = vmax.f32 %v931_v7, 0.0 }
 0x211   : > { %v1007_v30 = vrot.slane %v1006_v60, 2  ;;  %v1025_v53 = vrot.slane %v1024_v12, 2  ;;  %v992_v57 = vmax.f32 %v990_v24, %v991_v22  ;;  %v1029_v34 = vsel %vm974_vm8, %v970_v54, -inf }
 0x212   : > { %v1017_v61 = vmax.f32 %v1015_v25, %v1016_v8  ;;  %v948_v43 = vmax.f32 %v932_v63, 0.0  ;;  %v1039_v38 = vsel %vm974_vm8, %v973_v0, -inf  ;;  %v971_v1 = vsel %vm953_vm9, %v947_v44, 0.0 }
 0x213   : > { %v1008_v49 = vmax.f32 %v1006_v60, %v1007_v30  ;;  %v1026_v13 = vmax.f32 %v1024_v12, %v1025_v53  ;;  %v1030_v41 = vsel %vm974_vm8, %v971_v1, -inf  ;;  %v1001_v9 = vmax.f32 %v999_v27, %v1000_v36 }
 0x214   : > { %v1018_v48 = vrot.slane %v1017_v61, 1  ;;  %v972_v55 = vsel %vm952_vm7, %v948_v43, 0.0  ;;  %v1031_v14 = vmax.f32 %v1029_v34, %v1030_v41  ;;  %v1066_v21 = vsel %vm1065_vm10, %v992_v57, %v983_v20 }
 0x215   : > { %v1009_v17 = vrot.slane %v1008_v49, 1  ;;  %v1038_v56 = vsel %vm974_vm8, %v972_v55, -inf  ;;  %v1027_v33 = vrot.slane %v1026_v13, 1  ;;  %v1068_v2 = vsel %vm1067_vm11, %v1001_v9, %v1066_v21 }
 0x216   : > { %v1040_v42 = vmax.f32 %v1038_v56, %v1039_v38  ;;  %v1019_v58 = vmax.f32 %v1017_v61, %v1018_v48  ;;  %v1032_v4 = vrot.slane %v1031_v14, 4 }
 0x217   : > { %v1010_v24 = vmax.f32 %v1008_v49, %v1009_v17  ;;  %v1028_v5 = vmax.f32 %v1026_v13, %v1027_v33 }
 0x218   : > { %v1041_v10 = vrot.slane %v1040_v42, 4  ;;  %v1033_v50 = vmax.f32 %v1031_v14, %v1032_v4 }
 0x219   : > { %v1070_v11 = vsel %vm1069_vm12, %v1010_v24, %v1068_v2 }
 0x21a   : > { %v1042_v3 = vmax.f32 %v1040_v42, %v1041_v10  ;;  %v1072_v6 = vsel %vm1071_vm13, %v1019_v58, %v1070_v11  ;;  %v1034_v15 = vrot.slane %v1033_v50, 2 }
 0x21b   : > { %v1074_v28 = vsel %vm1073_vm14, %v1028_v5, %v1072_v6 }
 0x21c   : > { %v1043_v46 = vrot.slane %v1042_v3, 2  ;;  %v1035_v16 = vmax.f32 %v1033_v50, %v1034_v15 }
 0x21e   : > { %v1044_v26 = vmax.f32 %v1042_v3, %v1043_v46  ;;  %v1036_v51 = vrot.slane %v1035_v16, 1 }
 0x220   : > { %v1045_v18 = vrot.slane %v1044_v26, 1  ;;  %v1037_v31 = vmax.f32 %v1035_v16, %v1036_v51 }
 0x222   : > { %v1046_v19 = vmax.f32 %v1044_v26, %v1045_v18  ;;  %v1076_v29 = vsel %vm1075_vm15, %v1037_v31, %v1074_v28 }
 0x224   : > { %v1078_v59 = vsel %vm1077_vm0, %v1046_v19, %v1076_v29 }
 0x225   : > { %1425 = vmatmul.mubr.msk.f32.vlgmr.msra.gmra.mxu1 %vm974_vm8, %v1078_v59  ;;  %v1153_v40 = vsel %vm974_vm8, %v1078_v59, 0.0 }
 0x226   : > { %1154 = vst [vmem:[%s352_s11] sm:$0xff] %v1153_v40 }
 0x227   : > { %1643 = shalt.err (!%p1640_p10)
}
 0x228   : > { %s1644_s13 = scalar_lea.hbm %s1185_s23, 128  ;;  %s1648_s22 = scalar_lea.hbm %s2598_s7, 256 }
 0x229   : > { %p1645_p6 = scmp.ne.s32.totalorder %s1185_s23, %s1644_s13  ;;  %p1649_p3 = scmp.lt.s32.totalorder %s1185_s23, %s2598_s7 }
 0x22a   : > { %p1650_p11 = scmp.lt.s32.totalorder %s1648_s22, %s1644_s13 }
 0x22b   : > { %p1646_p4 = pnand %p1645_p6, %p2622_p1 }
 0x22c   : > { %p1651_p5 = por %p1650_p11, %p1649_p3 }
 0x22d   : > { %p1647_p8 = pneg %p1646_p4 }
 0x22f   : > { %p1652_p7 = pnand %p1651_p5, %p1647_p8 }
 0x231   : > { %1655 = shalt.err (!%p1652_p7)
}
 0x232   : > { %1450 = dma.vmem_to_hbm [thread:$0]  (%p2622_p1), %s1188_s1, 128, %s1185_s23, %s1161_s16   ;;  %v1352_v27 = vld [vmem:[%s2596_s5] ss:$0 sm:$0xff] }
 0x233   : > { %s345_s9 = scalar_lea.vmem [#allocation10], %s1333_s15  ;;  %s2623_s21 = sshll.u32 %s1808_s28, 7 }
 0x234   : > { %s1174_s10 = sshll.u32 %s345_s9, 4  ;;  %s2554_s11 = scalar_lea.hbm %s2597_s6, %s2623_s21  ;;  %s1175_s10 = int_to_ptr.vmem [resolvable:$true] %s1174_s10 }
 0x235   : > { %s1156_s22 = scalar_lea.sflag [#allocation4], %s1934_s19  ;;  %s1656_s23 = scalar_lea.vmem %s1175_s10, 128 }
 0x236   : > { %p1657_p12 = scmp.ne.s32.totalorder %s1175_s10, %s1656_s23  ;;  %s1746_s1 = smov [#allocation10]  }
 0x237   : > { %s1660_s15 = sshll.u32 %s1746_s1, 4  ;;  %s1661_s15 = int_to_ptr.vmem [resolvable:$false] %s1660_s15 }
 0x238   : > { %p1658_p9 = pnand %p1657_p12, %p2622_p1  ;;  %s1662_s16 = scalar_lea.vmem %s1661_s15, 256 }
 0x239   : > { %p1663_p0 = scmp.lt.s32.totalorder %s1175_s10, %s1661_s15  ;;  %p1664_p2 = scmp.lt.s32.totalorder %s1662_s16, %s1656_s23 }
 0x23a   : > { %p1659_p13 = pneg %p1658_p9 }
 0x23b   : > { %p1665_p10 = por %p1664_p2, %p1663_p0 }
 0x23d   : > { %p1666_p6 = pnand %p1665_p10, %p1659_p13 }
 0x2e5   : > { %v1147_v47 = vpop.f32.mrf.mxu1 }
 0x2e6   : > { %v1148_v52 = vadd.f32 %v1352_v27, %v1147_v47 }
 0x2e7   : > { %v1426_v39 = vpop.f32.mrf.mxu1 }
 0x2e8   : > { %1151 = vst [vmem:[%s345_s9] sm:$0xff] %v1148_v52 }
 0x2e9   : > { %1669 = shalt.err (!%p1666_p6)
}
 0x2ea   : > { %s1670_s28 = scalar_lea.hbm %s2554_s11, 128  ;;  %s1674_s29 = scalar_lea.hbm %s2597_s6, 256 }
 0x2eb   : > { %p1671_p4 = scmp.ne.s32.totalorder %s2554_s11, %s1670_s28  ;;  %p1675_p11 = scmp.lt.s32.totalorder %s2554_s11, %s2597_s6 }
 0x2ec   : > { %p1676_p5 = scmp.lt.s32.totalorder %s1674_s29, %s1670_s28 }
 0x2ed   : > { %p1672_p8 = pnand %p1671_p4, %p2622_p1 }
 0x2ee   : > { %p1677_p7 = por %p1676_p5, %p1675_p11 }
 0x2ef   : > { %p1673_p3 = pneg %p1672_p8 }
 0x2f1   : > { %p1678_p12 = pnand %p1677_p7, %p1673_p3 }
 0x2f3   : > { %1681 = shalt.err (!%p1678_p12)
}
 0x2f4   : > { %1449 = dma.vmem_to_hbm [thread:$0]  (%p2622_p1), %s1175_s10, 128, %s2554_s11, %s1156_s22  }
 0x2f5 PF: > { %s1199_s21 = sand.u32 1, %s1720_s24   ;;  %p2624_p9 = scmp.ne.s32.totalorder %s2608_s8, 0 }
 0x2f6   : > { %p2625_p13 = scmp.ge.s32.totalorder %s1732_s27, 2  ;;  %s1200_s13 = scalar_lea.sflag [#allocation4], %s1199_s21 }
 0x2f8   : > { %p1468_p0 = pnand %p2625_p13, %p2624_p9 }
 0x2fa   : > { %p1469_p2 = pneg %p1468_p0 }
 0x2fc   : > { %1711 = dma.done.wait (%p1469_p2), %s1200_s13, 128  }
 0x2fd   : > { %1713 = vsyncadd (%p1469_p2), %s1200_s13, 4294967168  ;;  %s1209_s12 = scalar_lea.sflag [#allocation12], %s1199_s21 }
 0x2fe   : > { %1715 = dma.done.wait (%p1469_p2), %s1209_s12, 128  }
 0x2ff   : > { %1717 = vsyncadd (%p1469_p2), %s1209_s12, 4294967168  ;;  %p26_p1 = scmp.ge.s32.totalorder %s1876_s14, 4   ;;  %s2626_s24 = smov %s1724_s25 }
 0x300   : > { %s2627_s25 = smov %s1728_s26  ;;  %s2628_s26 = smov %s1886_s17 }
 0x301   : > { %s2629_s27 = smov %s1876_s14  ;;  %28 = sbr.rel (!%p26_p1) target bundleno = 11 (0xb), region = 118 }
 0x306   :  { %1214 = vsyncpa [#allocation3], 1 }
 0x307   :  { %1216 = vsyncpa [#allocation3 + $0x1], 1 }
 0x308   :  { %1217 = vsyncpa [#allocation6], 1 }
 0x309   :  { %1218 = vsyncpa [#allocation9], 1 }
 0x30a   :  { %1219 = vsyncpa [#allocation4], 1 }
 0x30b   :  { %1221 = vsyncpa [#allocation4 + $0x1], 1 }
 0x30c   :  { %1222 = vsyncpa [#allocation12], 1 }
 0x30d   :  { %1224 = vsyncpa [#allocation12 + $0x1], 1 }

</bundles_post_ra>
